<compile_context>
chip_gen: v7x
topology: tpu7x:2x2x1
jax: 0.10.0
libtpu: 0.0.40
codegen_flags: <defaults>
</compile_context>

<pallas_src>
import functools

import jax
import jax.numpy as jnp
from jax.experimental import pallas as pl
from jax.experimental.pallas import tpu as pltpu

# ----------------------------- configuration --------------------------------
B = 4            # batch
N_STORY = 8      # number of sentences per story (== max_story_len)
T_C = 6          # words per sentence
T_Q = 5          # words per question
VOCAB = 32       # vocab_size
EMBED = 32       # embed_size
N_HOPS = 3
MAX_STORY_LEN = N_STORY
L1 = MAX_STORY_LEN + 1       # temporal-embedding table rows
K_RAW = VOCAB + L1           # 41: fused contraction dim (counts | temporal one-hot)
K_PAD = 48                   # padded up to a multiple of 8 (clean sublane tiling)


# ------------------------------- kernel -------------------------------------
def _memn2n_kernel(sf_ref, qc_ref, selP_ref, selPt_ref, selE_ref, selEt_ref,
                   wMC_ref, wB_ref, wLT_ref, bL_ref, out_ref,
                   *, embed, n_hops):
    """Single grid step; every ref is a full-array VMEM block.

    sf    : (B*n, K_PAD)  bf16  [bag-of-words counts | temporal one-hot | 0 pad]
    qc    : (B, V)        bf16  question bag-of-words counts
    selP  : (B*n, B)      f32   selP[r, b] = 1  iff  r // n == b
    selPt : (B, B*n)      f32   selP transposed
    selE  : (B*n, n)      f32   selE[r, j] = 1  iff  r %  n == j
    selEt : (n, B*n)      f32   selE transposed
    wMC   : (K_PAD, 2d)   f32   [[wA | wC]; [wA_T | wC_T]; zero pad rows]
    wB    : (V, d)        f32   question embedding table (row 0 == 0)
    wLT   : (d, V)        f32   final linear weight, pre-transposed
    bL    : (1, V)        f32   final linear bias
    out   : (B, V)        f32   logits
    """
    f32 = jnp.float32

    # ---- memory & context encodings: ONE fused MXU matmul -------------------
    mc = jnp.dot(sf_ref[...].astype(f32), wMC_ref[...],
                 preferred_element_type=f32)                  # (B*n, 2d)
    mem = mc[:, :embed]                                       # (B*n, d)
    ctx = mc[:, embed:]                                       # (B*n, d)

    # ---- question encoding ---------------------------------------------------
    u = jnp.dot(qc_ref[...].astype(f32), wB_ref[...],
                preferred_element_type=f32)                   # (B, d)

    selP, selPt = selP_ref[...], selPt_ref[...]
    selE, selEt = selE_ref[...], selEt_ref[...]

    # ---- multi-hop attention, fully 2-D (no 3-D reshapes / broadcasts) -------
    for _ in range(n_hops):
        # score[b, j] = <mem[b*n+j, :], u[b, :]>
        u_rep = jnp.dot(selP, u, preferred_element_type=f32)           # (B*n, d)
        s_flat = jnp.sum(mem * u_rep, axis=1, keepdims=True)           # (B*n, 1)
        score = jnp.dot(selPt, s_flat * selE,
                        preferred_element_type=f32)                    # (B, n)

        # softmax over sentence axis: fused exp(x - max), EUP approx reciprocal
        e = jnp.exp(score - jnp.max(score, axis=1, keepdims=True))
        probs = e * pl.reciprocal(jnp.sum(e, axis=1, keepdims=True), approx=True)

        # o[b, :] = sum_j probs[b, j] * ctx[b*n+j, :]
        w = jnp.dot(probs, selEt, preferred_element_type=f32) * selPt  # (B, B*n)
        u = u + jnp.dot(w, ctx, preferred_element_type=f32)            # (B, d)

    # ---- final linear: logits = u @ W^T + b -----------------------------------
    out_ref[...] = (jnp.dot(u, wLT_ref[...], preferred_element_type=f32)
                    + bL_ref[...])


def memn2n_pallas(s_fused, q_counts, selP, selPt, selE, selEt,
                  w_mc, wB, wLT, bL2):
    kernel = functools.partial(_memn2n_kernel, embed=EMBED, n_hops=N_HOPS)
    args = (s_fused, q_counts, selP, selPt, selE, selEt, w_mc, wB, wLT, bL2)

    # Everything fits trivially in VMEM at these toy sizes -> full-array blocks,
    # single grid step.  (For real B / vocab: grid over batch with "parallel"
    # semantics and tile the vocab axis — see TODO at the top of the file.)
    in_specs = [pl.BlockSpec(a.shape, lambda i, nd=a.ndim: (0,) * nd)
                for a in args]
    out_spec = pl.BlockSpec((B, VOCAB), lambda i: (0, 0))

    return pl.pallas_call(
        kernel,
        out_shape=jax.ShapeDtypeStruct((B, VOCAB), jnp.float32),
        grid=(1,),
        in_specs=in_specs,
        out_specs=out_spec,
        compiler_params=pltpu.CompilerParams(
            dimension_semantics=("arbitrary",)),
    )(*args)


# --------------------------- plain-JAX reference ----------------------------
def memn2n_reference(stories, questions, stories_masks,
                     wA, wB, wC, wAT, wCT, wL, bL):
    word_counts = jnp.sum(stories_masks == 0, axis=2)                    # (B, n)
    te_idx = (jnp.arange(1, N_STORY + 1)[None, :]
              * (word_counts >= 1)).astype(jnp.int32)                    # (B, n)
    u = wB[questions].sum(axis=1)                                        # (B, d)
    m = wA[stories].sum(axis=2) + wAT[te_idx]                            # (B, n, d)
    c = wC[stories].sum(axis=2) + wCT[te_idx]                            # (B, n, d)
    for _ in range(N_HOPS):
        score = jnp.einsum('bnd,bd->bn', m, u)
        probs = jax.nn.softmax(score, axis=1)
        o = jnp.einsum('bnd,bn->bd', c, probs)
        u = u + o
    return u @ wL.T + bL


# --------------------------------- main --------------------------------------
if __name__ == "__main__":
    key = jax.random.PRNGKey(0)
    ks = jax.random.split(key, 10)

    # deterministic parameter init (mimics nn.init.normal_(std=0.1), padding_idx=0)
    def emb_init(k, rows):
        w = 0.1 * jax.random.normal(k, (rows, EMBED), dtype=jnp.float32)
        return w.at[0].set(0.0)

    wA = emb_init(ks[0], VOCAB)
    wB = emb_init(ks[1], VOCAB)
    wC = emb_init(ks[2], VOCAB)
    wAT = emb_init(ks[3], L1)
    wCT = emb_init(ks[4], L1)
    wL = (1.0 / jnp.sqrt(EMBED)) * jax.random.normal(
        ks[5], (VOCAB, EMBED), dtype=jnp.float32)            # nn.Linear weight
    bL = 0.01 * jax.random.normal(ks[6], (VOCAB,), dtype=jnp.float32)

    # deterministic example inputs (token id 0 == padding)
    stories = jax.random.randint(ks[7], (B, N_STORY, T_C), 0, VOCAB,
                                 dtype=jnp.int32)
    # pad the tail of each sentence to exercise padding_idx / temporal masking
    stories = stories.at[:, :, T_C - 1:].set(0)
    stories = stories.at[:, N_STORY - 1, :].set(0)           # empty last sentence
    questions = jax.random.randint(ks[8], (B, T_Q), 1, VOCAB, dtype=jnp.int32)
    stories_masks = (stories == 0).astype(jnp.int32)         # 0 == real word

    # -------- glue: bag-of-words counts, temporal one-hots, selectors --------
    word_counts = jnp.sum(stories_masks == 0, axis=2)                    # (B, n)
    te_idx = (jnp.arange(1, N_STORY + 1)[None, :]
              * (word_counts >= 1)).astype(jnp.int32)                    # (B, n)
    s_counts = jax.nn.one_hot(stories, VOCAB, dtype=jnp.float32).sum(axis=2)
    s_counts = s_counts.reshape(B * N_STORY, VOCAB)                      # (B*n, V)
    te_oh = jax.nn.one_hot(te_idx, L1, dtype=jnp.float32).reshape(B * N_STORY, L1)
    q_counts = jax.nn.one_hot(questions, VOCAB, dtype=jnp.float32).sum(axis=1)

    # fused LHS, zero-padded to K_PAD cols; counts are small ints -> exact bf16
    s_fused = jnp.concatenate([s_counts, te_oh], axis=1)                 # (B*n, 41)
    s_fused = jnp.pad(s_fused, ((0, 0), (0, K_PAD - K_RAW))).astype(jnp.bfloat16)
    q_counts = q_counts.astype(jnp.bfloat16)

    # fused RHS weight: [[wA | wC]; [wA_T | wC_T]; zero pad rows]  -> (K_PAD, 2d)
    w_mc = jnp.concatenate([jnp.concatenate([wA, wC], axis=1),
                            jnp.concatenate([wAT, wCT], axis=1)], axis=0)
    w_mc = jnp.pad(w_mc, ((0, K_PAD - K_RAW), (0, 0)))

    # one-hot selection matrices for the fully 2-D hop loop
    r = jnp.arange(B * N_STORY)
    selP = (r[:, None] // N_STORY
            == jnp.arange(B)[None, :]).astype(jnp.float32)               # (B*n, B)
    selE = (r[:, None] % N_STORY
            == jnp.arange(N_STORY)[None, :]).astype(jnp.float32)         # (B*n, n)
    selPt = selP.T                                                       # (B, B*n)
    selEt = selE.T                                                       # (n, B*n)

    wLT = wL.T                           # (d, V) pre-transposed for the kernel
    bL2 = bL.reshape(1, VOCAB)

    out = memn2n_pallas(s_fused, q_counts, selP, selPt, selE, selEt,
                        w_mc, wB, wLT, bL2)
    out = jax.block_until_ready(out)

    ref = memn2n_reference(stories, questions, stories_masks,
                           wA, wB, wC, wAT, wCT, wL, bL)
    ref = jax.block_until_ready(ref)

    assert out.shape == (B, VOCAB)
    # Tolerance loosened slightly vs exact f32 because the softmax denominator
    # uses the EUP approximate reciprocal (all other arithmetic is f32-exact;
    # bf16 count inputs are exactly representable).
    assert jnp.allclose(out, ref, rtol=2e-3, atol=2e-3), (
        f"max abs diff {jnp.max(jnp.abs(out - ref))}")

    print("KERNEL_OK")
</pallas_src>

<mosaic_0001>
module attributes {stable_mosaic.version = 11 : i64} {
  func.func @_memn2n_kernel(%arg0: i32, %arg1: memref<32x48xbf16, #tpu.memory_space<vmem>>, %arg2: memref<4x32xbf16, #tpu.memory_space<vmem>>, %arg3: memref<32x4xf32, #tpu.memory_space<vmem>>, %arg4: memref<4x32xf32, #tpu.memory_space<vmem>>, %arg5: memref<32x8xf32, #tpu.memory_space<vmem>>, %arg6: memref<8x32xf32, #tpu.memory_space<vmem>>, %arg7: memref<48x64xf32, #tpu.memory_space<vmem>>, %arg8: memref<32x32xf32, #tpu.memory_space<vmem>>, %arg9: memref<32x32xf32, #tpu.memory_space<vmem>>, %arg10: memref<1x32xf32, #tpu.memory_space<vmem>>, %arg11: memref<4x32xf32, #tpu.memory_space<vmem>>) attributes {dimension_semantics = [#tpu.dimension_semantics<arbitrary>], iteration_bounds = array<i64: 1>, scalar_prefetch = 0 : i64, scratch_operands = 0 : i64, tpu.core_type = #tpu.core_type<tc>, window_params = [{pipeline_mode = #tpu.pipeline_mode<synchronous>, transform_indices = @transform_0, window_bounds = array<i64: 32, 48>}, {pipeline_mode = #tpu.pipeline_mode<synchronous>, transform_indices = @transform_1, window_bounds = array<i64: 4, 32>}, {pipeline_mode = #tpu.pipeline_mode<synchronous>, transform_indices = @transform_2, window_bounds = array<i64: 32, 4>}, {pipeline_mode = #tpu.pipeline_mode<synchronous>, transform_indices = @transform_3, window_bounds = array<i64: 4, 32>}, {pipeline_mode = #tpu.pipeline_mode<synchronous>, transform_indices = @transform_4, window_bounds = array<i64: 32, 8>}, {pipeline_mode = #tpu.pipeline_mode<synchronous>, transform_indices = @transform_5, window_bounds = array<i64: 8, 32>}, {pipeline_mode = #tpu.pipeline_mode<synchronous>, transform_indices = @transform_6, window_bounds = array<i64: 48, 64>}, {pipeline_mode = #tpu.pipeline_mode<synchronous>, transform_indices = @transform_7, window_bounds = array<i64: 32, 32>}, {pipeline_mode = #tpu.pipeline_mode<synchronous>, transform_indices = @transform_8, window_bounds = array<i64: 32, 32>}, {pipeline_mode = #tpu.pipeline_mode<synchronous>, transform_indices = @transform_9, window_bounds = array<i64: 1, 32>}, {pipeline_mode = #tpu.pipeline_mode<synchronous>, transform_indices = @transform_10, window_bounds = array<i64: 4, 32>}]} {
    %c0 = arith.constant 0 : index
    %c0_0 = arith.constant 0 : index
    %0 = vector.load %arg1[%c0, %c0_0] : memref<32x48xbf16, #tpu.memory_space<vmem>>, vector<32x48xbf16>
    %1 = arith.extf %0 : vector<32x48xbf16> to vector<32x48xf32>
    %c0_1 = arith.constant 0 : index
    %c0_2 = arith.constant 0 : index
    %2 = vector.load %arg7[%c0_1, %c0_2] : memref<48x64xf32, #tpu.memory_space<vmem>>, vector<48x64xf32>
    %cst = arith.constant dense<0.000000e+00> : vector<32x64xf32>
    %3 = tpu.matmul %1, %2, %cst {dimension_numbers = #tpu.dot_dimension_numbers<[1], [0], [0], [1], [0, 0, 1, 1], [], []>} : vector<32x48xf32>, vector<48x64xf32>, vector<32x64xf32> -> vector<32x64xf32>
    %4 = vector.extract_strided_slice %3 {offsets = [0, 0], sizes = [32, 32], strides = [1, 1]} : vector<32x64xf32> to vector<32x32xf32>
    %5 = vector.extract_strided_slice %3 {offsets = [0, 32], sizes = [32, 32], strides = [1, 1]} : vector<32x64xf32> to vector<32x32xf32>
    %c0_3 = arith.constant 0 : index
    %c0_4 = arith.constant 0 : index
    %6 = vector.load %arg2[%c0_3, %c0_4] : memref<4x32xbf16, #tpu.memory_space<vmem>>, vector<4x32xbf16>
    %7 = arith.extf %6 : vector<4x32xbf16> to vector<4x32xf32>
    %c0_5 = arith.constant 0 : index
    %c0_6 = arith.constant 0 : index
    %8 = vector.load %arg8[%c0_5, %c0_6] : memref<32x32xf32, #tpu.memory_space<vmem>>, vector<32x32xf32>
    %cst_7 = arith.constant dense<0.000000e+00> : vector<4x32xf32>
    %9 = tpu.matmul %7, %8, %cst_7 {dimension_numbers = #tpu.dot_dimension_numbers<[1], [0], [0], [1], [0, 0, 1, 1], [], []>} : vector<4x32xf32>, vector<32x32xf32>, vector<4x32xf32> -> vector<4x32xf32>
    %c0_8 = arith.constant 0 : index
    %c0_9 = arith.constant 0 : index
    %10 = vector.load %arg3[%c0_8, %c0_9] : memref<32x4xf32, #tpu.memory_space<vmem>>, vector<32x4xf32>
    %c0_10 = arith.constant 0 : index
    %c0_11 = arith.constant 0 : index
    %11 = vector.load %arg4[%c0_10, %c0_11] : memref<4x32xf32, #tpu.memory_space<vmem>>, vector<4x32xf32>
    %c0_12 = arith.constant 0 : index
    %c0_13 = arith.constant 0 : index
    %12 = vector.load %arg5[%c0_12, %c0_13] : memref<32x8xf32, #tpu.memory_space<vmem>>, vector<32x8xf32>
    %c0_14 = arith.constant 0 : index
    %c0_15 = arith.constant 0 : index
    %13 = vector.load %arg6[%c0_14, %c0_15] : memref<8x32xf32, #tpu.memory_space<vmem>>, vector<8x32xf32>
    %cst_16 = arith.constant dense<0.000000e+00> : vector<32x32xf32>
    %14 = tpu.matmul %10, %9, %cst_16 {dimension_numbers = #tpu.dot_dimension_numbers<[1], [0], [0], [1], [0, 0, 1, 1], [], []>} : vector<32x4xf32>, vector<4x32xf32>, vector<32x32xf32> -> vector<32x32xf32>
    %15 = arith.mulf %4, %14 : vector<32x32xf32>
    %cst_17 = arith.constant dense<0.000000e+00> : vector<32xf32>
    %16 = vector.multi_reduction <add>, %15, %cst_17 [1] : vector<32x32xf32> to vector<32xf32>
    %17 = vector.shape_cast %16 : vector<32xf32> to vector<32x1xf32>
    %18 = vector.broadcast %17 : vector<32x1xf32> to vector<32x8xf32>
    %19 = arith.mulf %18, %12 : vector<32x8xf32>
    %cst_18 = arith.constant dense<0.000000e+00> : vector<4x8xf32>
    %20 = tpu.matmul %11, %19, %cst_18 {dimension_numbers = #tpu.dot_dimension_numbers<[1], [0], [0], [1], [0, 0, 1, 1], [], []>} : vector<4x32xf32>, vector<32x8xf32>, vector<4x8xf32> -> vector<4x8xf32>
    %cst_19 = arith.constant dense<0xFF800000> : vector<4xf32>
    %21 = vector.multi_reduction <maximumf>, %20, %cst_19 [1] : vector<4x8xf32> to vector<4xf32>
    %22 = vector.shape_cast %21 : vector<4xf32> to vector<4x1xf32>
    %23 = vector.broadcast %22 : vector<4x1xf32> to vector<4x8xf32>
    %24 = arith.subf %20, %23 : vector<4x8xf32>
    %25 = math.exp %24 : vector<4x8xf32>
    %cst_20 = arith.constant dense<0.000000e+00> : vector<4xf32>
    %26 = vector.multi_reduction <add>, %25, %cst_20 [1] : vector<4x8xf32> to vector<4xf32>
    %27 = vector.shape_cast %26 : vector<4xf32> to vector<4x1xf32>
    %28 = tpu.reciprocal %27 {approx = true} : vector<4x1xf32> -> vector<4x1xf32>
    %29 = vector.broadcast %28 : vector<4x1xf32> to vector<4x8xf32>
    %30 = arith.mulf %25, %29 : vector<4x8xf32>
    %cst_21 = arith.constant dense<0.000000e+00> : vector<4x32xf32>
    %31 = tpu.matmul %30, %13, %cst_21 {dimension_numbers = #tpu.dot_dimension_numbers<[1], [0], [0], [1], [0, 0, 1, 1], [], []>} : vector<4x8xf32>, vector<8x32xf32>, vector<4x32xf32> -> vector<4x32xf32>
    %32 = arith.mulf %31, %11 : vector<4x32xf32>
    %cst_22 = arith.constant dense<0.000000e+00> : vector<4x32xf32>
    %33 = tpu.matmul %32, %5, %cst_22 {dimension_numbers = #tpu.dot_dimension_numbers<[1], [0], [0], [1], [0, 0, 1, 1], [], []>} : vector<4x32xf32>, vector<32x32xf32>, vector<4x32xf32> -> vector<4x32xf32>
    %34 = arith.addf %9, %33 : vector<4x32xf32>
    %cst_23 = arith.constant dense<0.000000e+00> : vector<32x32xf32>
    %35 = tpu.matmul %10, %34, %cst_23 {dimension_numbers = #tpu.dot_dimension_numbers<[1], [0], [0], [1], [0, 0, 1, 1], [], []>} : vector<32x4xf32>, vector<4x32xf32>, vector<32x32xf32> -> vector<32x32xf32>
    %36 = arith.mulf %4, %35 : vector<32x32xf32>
    %cst_24 = arith.constant dense<0.000000e+00> : vector<32xf32>
    %37 = vector.multi_reduction <add>, %36, %cst_24 [1] : vector<32x32xf32> to vector<32xf32>
    %38 = vector.shape_cast %37 : vector<32xf32> to vector<32x1xf32>
    %39 = vector.broadcast %38 : vector<32x1xf32> to vector<32x8xf32>
    %40 = arith.mulf %39, %12 : vector<32x8xf32>
    %cst_25 = arith.constant dense<0.000000e+00> : vector<4x8xf32>
    %41 = tpu.matmul %11, %40, %cst_25 {dimension_numbers = #tpu.dot_dimension_numbers<[1], [0], [0], [1], [0, 0, 1, 1], [], []>} : vector<4x32xf32>, vector<32x8xf32>, vector<4x8xf32> -> vector<4x8xf32>
    %cst_26 = arith.constant dense<0xFF800000> : vector<4xf32>
    %42 = vector.multi_reduction <maximumf>, %41, %cst_26 [1] : vector<4x8xf32> to vector<4xf32>
    %43 = vector.shape_cast %42 : vector<4xf32> to vector<4x1xf32>
    %44 = vector.broadcast %43 : vector<4x1xf32> to vector<4x8xf32>
    %45 = arith.subf %41, %44 : vector<4x8xf32>
    %46 = math.exp %45 : vector<4x8xf32>
    %cst_27 = arith.constant dense<0.000000e+00> : vector<4xf32>
    %47 = vector.multi_reduction <add>, %46, %cst_27 [1] : vector<4x8xf32> to vector<4xf32>
    %48 = vector.shape_cast %47 : vector<4xf32> to vector<4x1xf32>
    %49 = tpu.reciprocal %48 {approx = true} : vector<4x1xf32> -> vector<4x1xf32>
    %50 = vector.broadcast %49 : vector<4x1xf32> to vector<4x8xf32>
    %51 = arith.mulf %46, %50 : vector<4x8xf32>
    %cst_28 = arith.constant dense<0.000000e+00> : vector<4x32xf32>
    %52 = tpu.matmul %51, %13, %cst_28 {dimension_numbers = #tpu.dot_dimension_numbers<[1], [0], [0], [1], [0, 0, 1, 1], [], []>} : vector<4x8xf32>, vector<8x32xf32>, vector<4x32xf32> -> vector<4x32xf32>
    %53 = arith.mulf %52, %11 : vector<4x32xf32>
    %cst_29 = arith.constant dense<0.000000e+00> : vector<4x32xf32>
    %54 = tpu.matmul %53, %5, %cst_29 {dimension_numbers = #tpu.dot_dimension_numbers<[1], [0], [0], [1], [0, 0, 1, 1], [], []>} : vector<4x32xf32>, vector<32x32xf32>, vector<4x32xf32> -> vector<4x32xf32>
    %55 = arith.addf %34, %54 : vector<4x32xf32>
    %cst_30 = arith.constant dense<0.000000e+00> : vector<32x32xf32>
    %56 = tpu.matmul %10, %55, %cst_30 {dimension_numbers = #tpu.dot_dimension_numbers<[1], [0], [0], [1], [0, 0, 1, 1], [], []>} : vector<32x4xf32>, vector<4x32xf32>, vector<32x32xf32> -> vector<32x32xf32>
    %57 = arith.mulf %4, %56 : vector<32x32xf32>
    %cst_31 = arith.constant dense<0.000000e+00> : vector<32xf32>
    %58 = vector.multi_reduction <add>, %57, %cst_31 [1] : vector<32x32xf32> to vector<32xf32>
    %59 = vector.shape_cast %58 : vector<32xf32> to vector<32x1xf32>
    %60 = vector.broadcast %59 : vector<32x1xf32> to vector<32x8xf32>
    %61 = arith.mulf %60, %12 : vector<32x8xf32>
    %cst_32 = arith.constant dense<0.000000e+00> : vector<4x8xf32>
    %62 = tpu.matmul %11, %61, %cst_32 {dimension_numbers = #tpu.dot_dimension_numbers<[1], [0], [0], [1], [0, 0, 1, 1], [], []>} : vector<4x32xf32>, vector<32x8xf32>, vector<4x8xf32> -> vector<4x8xf32>
    %cst_33 = arith.constant dense<0xFF800000> : vector<4xf32>
    %63 = vector.multi_reduction <maximumf>, %62, %cst_33 [1] : vector<4x8xf32> to vector<4xf32>
    %64 = vector.shape_cast %63 : vector<4xf32> to vector<4x1xf32>
    %65 = vector.broadcast %64 : vector<4x1xf32> to vector<4x8xf32>
    %66 = arith.subf %62, %65 : vector<4x8xf32>
    %67 = math.exp %66 : vector<4x8xf32>
    %cst_34 = arith.constant dense<0.000000e+00> : vector<4xf32>
    %68 = vector.multi_reduction <add>, %67, %cst_34 [1] : vector<4x8xf32> to vector<4xf32>
    %69 = vector.shape_cast %68 : vector<4xf32> to vector<4x1xf32>
    %70 = tpu.reciprocal %69 {approx = true} : vector<4x1xf32> -> vector<4x1xf32>
    %71 = vector.broadcast %70 : vector<4x1xf32> to vector<4x8xf32>
    %72 = arith.mulf %67, %71 : vector<4x8xf32>
    %cst_35 = arith.constant dense<0.000000e+00> : vector<4x32xf32>
    %73 = tpu.matmul %72, %13, %cst_35 {dimension_numbers = #tpu.dot_dimension_numbers<[1], [0], [0], [1], [0, 0, 1, 1], [], []>} : vector<4x8xf32>, vector<8x32xf32>, vector<4x32xf32> -> vector<4x32xf32>
    %74 = arith.mulf %73, %11 : vector<4x32xf32>
    %cst_36 = arith.constant dense<0.000000e+00> : vector<4x32xf32>
    %75 = tpu.matmul %74, %5, %cst_36 {dimension_numbers = #tpu.dot_dimension_numbers<[1], [0], [0], [1], [0, 0, 1, 1], [], []>} : vector<4x32xf32>, vector<32x32xf32>, vector<4x32xf32> -> vector<4x32xf32>
    %76 = arith.addf %55, %75 : vector<4x32xf32>
    %c0_37 = arith.constant 0 : index
    %c0_38 = arith.constant 0 : index
    %77 = vector.load %arg9[%c0_37, %c0_38] : memref<32x32xf32, #tpu.memory_space<vmem>>, vector<32x32xf32>
    %cst_39 = arith.constant dense<0.000000e+00> : vector<4x32xf32>
    %78 = tpu.matmul %76, %77, %cst_39 {dimension_numbers = #tpu.dot_dimension_numbers<[1], [0], [0], [1], [0, 0, 1, 1], [], []>} : vector<4x32xf32>, vector<32x32xf32>, vector<4x32xf32> -> vector<4x32xf32>
    %c0_40 = arith.constant 0 : index
    %c0_41 = arith.constant 0 : index
    %79 = vector.load %arg10[%c0_40, %c0_41] : memref<1x32xf32, #tpu.memory_space<vmem>>, vector<1x32xf32>
    %80 = vector.broadcast %79 : vector<1x32xf32> to vector<4x32xf32>
    %81 = arith.addf %78, %80 : vector<4x32xf32>
    %c0_42 = arith.constant 0 : index
    %c0_43 = arith.constant 0 : index
    %82 = vector.load %arg11[%c0_42, %c0_43] : memref<4x32xf32, #tpu.memory_space<vmem>>, vector<4x32xf32>
    tpu.vector_store %arg11[%c0_42, %c0_43], %81 {strides = array<i32>} : memref<4x32xf32, #tpu.memory_space<vmem>>, vector<4x32xf32>,
    return
  }
  func.func @transform_0(%arg0: i32) -> (i32, i32) {
    %c0_i32 = arith.constant 0 : i32
    %c0_i32_0 = arith.constant 0 : i32
    %c0_i32_1 = arith.constant 0 : i32
    return %c0_i32, %c0_i32_0 : i32, i32
  }
  func.func @transform_1(%arg0: i32) -> (i32, i32) {
    %c0_i32 = arith.constant 0 : i32
    %c0_i32_0 = arith.constant 0 : i32
    %c0_i32_1 = arith.constant 0 : i32
    return %c0_i32, %c0_i32_0 : i32, i32
  }
  func.func @transform_2(%arg0: i32) -> (i32, i32) {
    %c0_i32 = arith.constant 0 : i32
    %c0_i32_0 = arith.constant 0 : i32
    %c0_i32_1 = arith.constant 0 : i32
    return %c0_i32, %c0_i32_0 : i32, i32
  }
  func.func @transform_3(%arg0: i32) -> (i32, i32) {
    %c0_i32 = arith.constant 0 : i32
    %c0_i32_0 = arith.constant 0 : i32
    %c0_i32_1 = arith.constant 0 : i32
    return %c0_i32, %c0_i32_0 : i32, i32
  }
  func.func @transform_4(%arg0: i32) -> (i32, i32) {
    %c0_i32 = arith.constant 0 : i32
    %c0_i32_0 = arith.constant 0 : i32
    %c0_i32_1 = arith.constant 0 : i32
    return %c0_i32, %c0_i32_0 : i32, i32
  }
  func.func @transform_5(%arg0: i32) -> (i32, i32) {
    %c0_i32 = arith.constant 0 : i32
    %c0_i32_0 = arith.constant 0 : i32
    %c0_i32_1 = arith.constant 0 : i32
    return %c0_i32, %c0_i32_0 : i32, i32
  }
  func.func @transform_6(%arg0: i32) -> (i32, i32) {
    %c0_i32 = arith.constant 0 : i32
    %c0_i32_0 = arith.constant 0 : i32
    %c0_i32_1 = arith.constant 0 : i32
    return %c0_i32, %c0_i32_0 : i32, i32
  }
  func.func @transform_7(%arg0: i32) -> (i32, i32) {
    %c0_i32 = arith.constant 0 : i32
    %c0_i32_0 = arith.constant 0 : i32
    %c0_i32_1 = arith.constant 0 : i32
    return %c0_i32, %c0_i32_0 : i32, i32
  }
  func.func @transform_8(%arg0: i32) -> (i32, i32) {
    %c0_i32 = arith.constant 0 : i32
    %c0_i32_0 = arith.constant 0 : i32
    %c0_i32_1 = arith.constant 0 : i32
    return %c0_i32, %c0_i32_0 : i32, i32
  }
  func.func @transform_9(%arg0: i32) -> (i32, i32) {
    %c0_i32 = arith.constant 0 : i32
    %c0_i32_0 = arith.constant 0 : i32
    %c0_i32_1 = arith.constant 0 : i32
    return %c0_i32, %c0_i32_0 : i32, i32
  }
  func.func @transform_10(%arg0: i32) -> (i32, i32) {
    %c0_i32 = arith.constant 0 : i32
    %c0_i32_0 = arith.constant 0 : i32
    %c0_i32_1 = arith.constant 0 : i32
    return %c0_i32, %c0_i32_0 : i32, i32
  }
}

</mosaic_0001>

<bundles_post_ra>
// kernel: tpu_custom_call.1
= control target key start
LH: loop header
LB: loop body
LE: loop exit
PB: predicated region body
PF: predicated region fallthrough
CT: control target
= control target key end

     0   :  { %15 = vsyncpa [#allocation3], 0  ;;  %s2193_s0 = inlined_call_operand.hbm [shape: bf16[32,48], index: 0, kind: input, shape index: {}]   ;;  %s2194_s1 = inlined_call_operand.vmem [shape: bf16[4,32], index: 1, kind: input, shape index: {}]   ;;  %s2195_s2 = inlined_call_operand.vmem [shape: f32[32,4], index: 2, kind: input, shape index: {}]   ;;  %s2196_s3 = inlined_call_operand.vmem [shape: f32[4,32], index: 3, kind: input, shape index: {}]   ;;  %s2197_s4 = inlined_call_operand.vmem [shape: f32[32,8], index: 4, kind: input, shape index: {}]   ;;  %s2198_s5 = inlined_call_operand.vmem [shape: f32[8,32], index: 5, kind: input, shape index: {}]   ;;  %s2199_s6 = inlined_call_operand.vmem [shape: f32[48,64], index: 6, kind: input, shape index: {}]   ;;  %s2200_s7 = inlined_call_operand.vmem [shape: f32[32,32], index: 7, kind: input, shape index: {}]   ;;  %s2201_s8 = inlined_call_operand.hbm [shape: f32[32,32], index: 8, kind: input, shape index: {}]   ;;  %s2202_s9 = inlined_call_operand.vmem [shape: f32[1,32], index: 9, kind: input, shape index: {}]   ;;  %s2203_s10 = inlined_call_operand.hbm [shape: f32[4,32], index: 10, kind: output, shape index: {}]  }
   0x1   :  { %16 = vsyncpa [#allocation6], 0 }
   0x2   :  { %17 = vsyncpa [#allocation4], 0  ;;  %s1835_s13 = smov [#allocation2]   ;;  %s1763_s17 = scalar_lea.hbm %s2193_s0, 256 }
   0x3   :  { %s23_s14 = sshll.u32 %s1835_s13, 4  ;;  %p1764_p0 = scmp.ne.s32.totalorder %s2193_s0, %s1763_s17  ;;  %s24_s14 = int_to_ptr.vmem [resolvable:$true] %s23_s14 }
   0x4   :  { %p1767_p1 = scmp.lt.u32.totalorder %s1763_s17, %s2193_s0 }
   0x6   :  { %p1769_p2 = pnand %p1767_p1, %p1764_p0 }
   0x8   :  { %1772 = shalt.err (!%p1769_p2)
}
   0x9   :  { %s1773_s22 = scalar_lea.vmem %s24_s14, 256  ;;  %p1778_p4 = scmp.lt.s32.totalorder %s24_s14, %s24_s14 }
   0xa   :  { %p1774_p3 = scmp.ne.s32.totalorder %s24_s14, %s1773_s22  ;;  %p1779_p5 = scmp.lt.s32.totalorder %s1773_s22, %s1773_s22 }
   0xc   :  { %p1780_p6 = por %p1779_p5, %p1778_p4 }
   0xe   :  { %p1781_p7 = pnand %p1780_p6, %p1774_p3 }
  0x10   :  { %1784 = shalt.err (!%p1781_p7)
}
  0x11   :  { %s1836_s23 = smov 64   ;;  %s1837_s24 = smov 4  }
  0x12   :  { %29 = dma.hbm_to_vmem [thread:$0]  %s2193_s0, 256, %s24_s14, [#allocation3], %s1836_s23, %s1836_s23, %s1837_s24  }
  0x13   :  { %s1838_s27 = smov [#allocation5]   ;;  %s1785_s11 = scalar_lea.hbm %s2201_s8, 512 }
  0x14   :  { %s49_s28 = sshll.u32 %s1838_s27, 4  ;;  %p1786_p8 = scmp.ne.s32.totalorder %s2201_s8, %s1785_s11  ;;  %s50_s28 = int_to_ptr.vmem [resolvable:$true] %s49_s28 }
  0x15   :  { %p1789_p9 = scmp.lt.u32.totalorder %s1785_s11, %s2201_s8 }
  0x17   :  { %p1791_p10 = pnand %p1789_p9, %p1786_p8 }
  0x19   :  { %1794 = shalt.err (!%p1791_p10)
}
  0x1a   :  { %s1795_s17 = scalar_lea.vmem %s50_s28, 512  ;;  %p1800_p12 = scmp.lt.s32.totalorder %s50_s28, %s50_s28 }
  0x1b   :  { %p1796_p11 = scmp.ne.s32.totalorder %s50_s28, %s1795_s17  ;;  %p1801_p13 = scmp.lt.s32.totalorder %s1795_s17, %s1795_s17 }
  0x1d   :  { %p1802_p0 = por %p1801_p13, %p1800_p12 }
  0x1f   :  { %p1803_p1 = pnand %p1802_p0, %p1796_p11 }
  0x21   :  { %1806 = shalt.err (!%p1803_p1)
}
  0x22   :  { %s1839_s0 = smov 128   ;;  %s1840_s14 = smov 8  }
  0x23   :  { %55 = dma.hbm_to_vmem [thread:$0]  %s2201_s8, 512, %s50_s28, [#allocation6], %s1839_s0, %s1839_s0, %s1840_s14  }
  0x24   :  { %1829 = dma.done.wait [#allocation3], 256  }
  0x25   :  { %1830 = vsyncadd [#allocation3], 4294967040 }
  0x26   :  { %1831 = dma.done.wait [#allocation6], 512  }
  0x27   :  { %1832 = vsyncadd [#allocation6], 4294966784  ;;  %v1841_v0 = vmov 0.0|0.0   ;;  %vm1842_vm0 = vmmov 0   ;;  %v1843_v1 = vmov 0.0   ;;  %v178_v2 = vld [vmem:[%s2200_s7] sm:$0xff] }
  0x28   :  { %1682 = vmatprep.subr.bf16.mxu1 %v1841_v0  ;;  %1551 = vmatprep.mubr.msk.f32.mxu1 %vm1842_vm0, %v1843_v1  ;;  %v179_v3 = vld [vmem:[%s2200_s7 + $0x8] sm:$0xff]  ;;  %v180_v4 = vld [vmem:[%s2200_s7 + $0x10] sm:$0xff]  ;;  %v181_v6 = vld [vmem:[%s2200_s7 + $0x18] sm:$0xff]  ;;  %vm182_vm1 = vcmask 261120   ;;  %vm78_vm2 = vcmask 392192   ;;  %vm266_vm3 = vcmask 31744  }
  0x29   :  { %v1683_v5 = vpack.c.bf16 %v179_v3, %v178_v2  ;;  %v72_v7 = vld [vmem:[%s2199_s6] sm:$0xff]  ;;  %v73_v8 = vld [vmem:[%s2199_s6 + $0x8] sm:$0xff]  ;;  %v74_v9 = vld [vmem:[%s2199_s6 + $0x10] sm:$0xff]  ;;  %v1686_v11 = vpack.c.bf16 %v181_v6, %v180_v4  ;;  %vm279_vm4 = vcmask 1043456   ;;  %vm461_vm5 = vcmask 60416   ;;  %s1845_s16 = smov [#allocation7]  }
  0x2a   :  { %v75_v10 = vld [vmem:[%s2199_s6 + $0x18] sm:$0xff]  ;;  %v176_v12 = vld [vmem:[%s2194_s1] sm:$0x3]  ;;  %v1670_v13 = vpack.c.bf16 %v73_v8, %v72_v7  ;;  %v77_v16 = vld [vmem:[%s2199_s6 + $0x28] sm:$0xff]  ;;  %vm473_vm6 = vcmask 64512   ;;  %s1404_s7 = sshll.u32 %s1845_s16, 4  ;;  %s1405_s7 = int_to_ptr.vmem [resolvable:$true] %s1404_s7 }
  0x2b   :  { %1684 = vmatpush3.bf16.msra.mxu1 %v1683_v5  ;;  %v1674_v14 = vpack.c.bf16 %v75_v10, %v74_v9  ;;  %v76_v15 = vld [vmem:[%s2199_s6 + $0x20] sm:$0xff]  ;;  %v177_v17 = vunpack.c.l.bf16 %v176_v12  ;;  %v1453_v23 = vld [vmem:[#allocation2 + $0x8] sm:$0xff]   ;;  %v1985_v29 = vld [vmem:[%s2195_s2 + $0x10] sm:$0xff]  ;;  %vm1396_vm7 = vcmask 257024   ;;  %s1807_s17 = scalar_lea.vmem %s1405_s7, 64  ;;  %p1812_p3 = scmp.lt.s32.totalorder %s1405_s7, %s1405_s7 }
  0x2c   :  { %1685 = vmatprep.subr.bf16.mxu1 %v1841_v0  ;;  %1671 = vmatprep.subr.bf16.mxu0 %v1670_v13  ;;  %v1678_v18 = vpack.c.bf16 %v77_v16, %v76_v15  ;;  %v1446_v19 = vld [vmem:[#allocation2] sm:$0xff]   ;;  %v1451_v24 = vunpack.c.l.bf16 %v1453_v23  ;;  %v1452_v25 = vunpack.c.h.bf16 %v1453_v23  ;;  %v1978_v27 = vld [vmem:[%s2195_s2 + $0x8] sm:$0xff]  ;;  %v1997_v30 = vld [vmem:[%s2195_s2 + $0x18] sm:$0xff]  ;;  %p1808_p2 = scmp.ne.s32.totalorder %s1405_s7, %s1807_s17  ;;  %p1813_p4 = scmp.lt.s32.totalorder %s1807_s17, %s1807_s17 }
  0x2d   :  { %1673 = vmatpush3.bf16.msra.mxu0 %v1670_v13  ;;  %v1447_v20 = vunpack.c.l.bf16 %v1446_v19  ;;  %v1448_v21 = vunpack.c.h.bf16 %v1446_v19  ;;  %v1967_v22 = vld [vmem:[%s2195_s2] sm:$0xff]  ;;  %v2031_v51 = vld [vmem:[%s2197_s4 + $0x8] sm:$0xff]  ;;  %v2038_v56 = vld [vmem:[%s2197_s4 + $0x10] sm:$0xff] }
  0x2e   :  { %1675 = vmatprep.subr.bf16.mxu0 %v1674_v14  ;;  %v2026_v50 = vld [vmem:[%s2197_s4] sm:$0xff]  ;;  %v2043_v57 = vld [vmem:[%s2197_s4 + $0x18] sm:$0xff]  ;;  %s1844_s4 = smov 96   ;;  %p1814_p5 = por %p1813_p4, %p1812_p3 }
  0x2f   :  { %1687 = vmatpush3.bf16.msra.mxu1 %v1686_v11  ;;  %1537 = vmatprep.mubr.msk.f32.mxu0 %vm78_vm2, %v1447_v20  ;;  %v2051_v63 = vld [vmem:[%s2196_s3] sm:$0xf] }
  0x30   :  { %p1815_p6 = pnand %p1814_p5, %p1808_p2 }
  0x31   :  { %1677 = vmatpush3.bf16.msra.mxu0 %v1674_v14  ;;  %v2067_v14 = vld [vmem:[%s2198_s5] sm:$0xff] }
  0x32   :  { %1552 = vmatmul.mubr.msk.f32.vlgmr.msra.gmra.mrb[0].mxu1 %vm182_vm1, %v177_v17  ;;  %1679 = vmatprep.subr.bf16.mxu0 %v1678_v18 }
  0x33   :  { %1556 = vmatprep.mubr.msk.f32.mxu1 %vm266_vm3, %v1967_v22 }
  0x35   :  { %1681 = vmatpush3.bf16.msra.mxu0 %v1678_v18 }
  0x36   :  { %1688 = vmatprep.subr.bf16.mxu0 %v1841_v0 }
  0x38   :  { %1538 = vmatmul.mubr.msk.f32.vlgmr.msra.gmra.mrb[0].mxu0 %vm78_vm2, %v1448_v21 }
  0x39   :  { %1540 = vmatprep.mubr.msk.f32.mxu0 %vm78_vm2, %v1451_v24 }
  0x3c   :  { %1541 = vmatmul.mubr.msk.f32.gmra.mrb[2].mxu0 %vm78_vm2, %v1452_v25 }
  0x3d   :  { %1570 = vmatprep.mubr.msk.f32.mxu0 %vm1842_vm0, %v1843_v1 }
 0x105   :  { %v1973_v26 = vpop.f32.mrb[0].mxu1 }
 0x106   :  { %v1553_v28 = vpop.f32.mrb[1].mxu1  ;;  %1554 = vmatprep.subr.msk.mxu1 %vm279_vm4, %v1973_v26 }
 0x107   :  { %1555 = vmatpush3.msk.msra.mxu1 %vm279_vm4, %v1973_v26 }
 0x108   :  { %1557 = vmatmul.mubr.msk.f32.vlgmr.msra.gmra.mrb[2].mxu1 %vm266_vm3, %v1978_v27  ;;  %1573 = vmatprep.subr.mxu1 %v1843_v1 }
 0x109   :  { %1559 = vmatprep.mubr.msk.f32.mxu1 %vm266_vm3, %v1985_v29  ;;  %1574 = vmatpush3.msra.mxu1 %v2067_v14 }
 0x10b   :  { %v2003_v31 = vpop.f32.mrb[0].mxu0 }
 0x10c   :  { %1560 = vmatmul.mubr.msk.f32.gmra.mrb[4].mxu1 %vm266_vm3, %v1997_v30  ;;  %v2005_v32 = vpop.f32.mrb[1].mxu0 }
 0x10d   :  { %1575 = vmatprep.mubr.msk.f32.mxu1 %vm1842_vm0, %v1843_v1  ;;  %v1741_v33 = vpack.i.bf16 %v2003_v31, %v2005_v32 }
 0x10f   :  { %v2009_v34 = vpop.f32.mrb[2].mxu0 }
 0x110   :  { %v2011_v35 = vpop.f32.mrb[3].mxu0 }
 0x111   :  { %v1746_v36 = vpack.i.bf16 %v2009_v34, %v2011_v35 }
 0x1db   :  { %v1558_v37 = vpop.f32.mrb[2].mxu1 }
 0x1dc   :  { %v369_v38 = vmul.f32 %v1558_v37, %v2003_v31  ;;  %v349_v39 = vpop.f32.mrb[3].mxu1 }
 0x1dd   :  { %v368_v40 = vmul.f32 %v349_v39, %v2005_v32 }
 0x1de   :  { %v375_v46 = vsel %vm182_vm1, %v369_v38, 0.0 }
 0x1df   :  { %v1561_v41 = vpop.f32.mrb[4].mxu1  ;;  %v372_v42 = vsel %vm182_vm1, %v368_v40, 0.0 }
 0x1e0   :  { %v371_v43 = vmul.f32 %v1561_v41, %v2009_v34  ;;  %v359_v44 = vpop.f32.mrb[5].mxu1  ;;  %373 = vadd.xlane.f32.xlu0 %v372_v42 }
 0x1e1   :  { %v370_v45 = vmul.f32 %v359_v44, %v2011_v35 }
 0x1e2   :  { %v381_v48 = vsel %vm182_vm1, %v371_v43, 0.0 }
 0x1e3   :  { %v378_v47 = vsel %vm182_vm1, %v370_v45, 0.0 }
 0x1e4   :  { %376 = vadd.xlane.f32.xlu0 %v375_v46  ;;  %379 = vadd.xlane.f32.xlu1 %v378_v47 }
 0x1e8   :  { %382 = vadd.xlane.f32.xlu1 %v381_v48 }
 0x26d   :  { %v374_v49 = vpop.xlane.xlu0 %373 }
 0x26e   :  { %v384_v54 = vmul.f32 %v374_v49, %v2026_v50 }
 0x271   :  { %v377_v52 = vpop.xlane.xlu0 %376  ;;  %v380_v53 = vpop.xlane.xlu1 %379 }
 0x272   :  { %v385_v55 = vmul.f32 %v377_v52, %v2031_v51  ;;  %v386_v60 = vmul.f32 %v380_v53, %v2038_v56 }
 0x274   :  { %v1689_v58 = vpack.c.bf16 %v385_v55, %v384_v54 }
 0x275   :  { %v383_v59 = vpop.xlane.xlu1 %382 }
 0x276   :  { %v387_v61 = vmul.f32 %v383_v59, %v2043_v57  ;;  %1690 = vmatpush3.bf16.msra.mxu0 %v1689_v58 }
 0x277   :  { %1691 = vmatprep.subr.bf16.mxu0 %v1841_v0 }
 0x278   :  { %v1692_v62 = vpack.c.bf16 %v387_v61, %v386_v60 }
 0x27a   :  { %1693 = vmatpush3.bf16.msra.mxu0 %v1692_v62 }
 0x27b   :  { %1694 = vmatprep.subr.bf16.mxu0 %v1841_v0 }
 0x27d   :  { %1571 = vmatmul.mubr.msk.f32.vlgmr.msra.gmra.mrb[4].mxu0 %vm182_vm1, %v2051_v63 }
 0x27e   :  { %1586 = vmatprep.mubr.msk.f32.mxu0 %vm1842_vm0, %v1843_v1 }
 0x350   :  { %v457_v2 = vpop.f32.mrb[4].mxu0 }
 0x351   :  { %v1572_v3 = vpop.f32.mrb[5].mxu0  ;;  %v462_v4 = vsel %vm461_vm5, %v457_v2, -inf }
 0x352   :  { %463 = vmax.xlane.f32.xlu0 %v462_v4 }
 0x368   :  { %1742 = vrot.lane.b32.xlu0 %v1741_v33, %s1844_s4 }
 0x3df   :  { %v464_v5 = vpop.xlane.xlu0 %463 }
 0x3e0   :  { %v465_v6 = vsub.f32 %v457_v2, %v464_v5 }
 0x3e2   :  { %v466_v7 = vmul.f32 1.442695, %v465_v6 }
 0x3e3   :  { %v1743_v8 = vpop.permute.xlu0 %1742 }
 0x3e4   :  { %1751 = vpow2.f32 %v466_v7  ;;  %v1745_v9 = vunpack.i.h.bf16 %v1743_v8  ;;  %v1744_v10 = vunpack.i.l.bf16 %v1743_v8 }
 0x3e6   :  { %v2059_v11 = vpack.c.bf16 %v1745_v9, %v1744_v10 }
 0x3e8   :  { %1696 = vmatpush3.bf16.msra.mxu0 %v2059_v11 }
 0x3e9   :  { %1697 = vmatprep.subr.bf16.mxu0 %v1841_v0 }
 0x3ee   :  { %v1752_v12 = vpop.eup %1751 }
 0x3ef   :  { %v468_v13 = vsel %vm461_vm5, %v1752_v12, 0.0 }
 0x3f0   :  { %469 = vadd.xlane.f32.xlu1 %v468_v13 }
 0x401   :  { %1747 = vrot.lane.b32.xlu1 %v1746_v36, %s1844_s4 }
 0x47d   :  { %v470_v15 = vpop.xlane.xlu1 %469 }
 0x47e   :  { %1753 = vrcp.f32 %v470_v15 }
 0x481   :  { %v1748_v16 = vpop.permute.xlu1 %1747 }
 0x482   :  { %v1750_v17 = vunpack.i.h.bf16 %v1748_v16  ;;  %v1749_v18 = vunpack.i.l.bf16 %v1748_v16 }
 0x484   :  { %v2070_v19 = vpack.c.bf16 %v1750_v17, %v1749_v18 }
 0x486   :  { %1699 = vmatpush3.bf16.msra.mxu0 %v2070_v19 }
 0x487   :  { %1608 = vmatprep.subr.mxu0 %v1843_v1 }
 0x488   :  { %v1754_v20 = vpop.eup %1753 }
 0x489   :  { %v472_v21 = vmul.f32 %v1754_v20, %v1752_v12 }
 0x48b   :  { %1576 = vmatmul.mubr.msk.f32.vlgmr.msra.gmra.mrb[6].mxu1 %vm473_vm6, %v472_v21 }
 0x48c   :  { %1591 = vmatprep.mubr.msk.f32.mxu1 %vm266_vm3, %v1967_v22 }
 0x55e   :  { %v543_v23 = vpop.f32.mrb[6].mxu1 }
 0x55f   :  { %v547_v24 = vmul.f32 %v543_v23, %v2051_v63  ;;  %v1577_v25 = vpop.f32.mrb[7].mxu1 }
 0x561   :  { %1587 = vmatmul.mubr.msk.f32.vlgmr.msra.gmra.mrb[6].mxu0 %vm182_vm1, %v547_v24 }
 0x562   :  { %1609 = vmatpush3.msra.mxu0 %v2067_v14  ;;  %1610 = vmatprep.mubr.msk.f32.mxu0 %vm1842_vm0, %v1843_v1 }
 0x563   :  { %1706 = vmatprep.subr.bf16.mxu0 %v1841_v0 }
 0x634   :  { %v633_v28 = vpop.f32.mrb[6].mxu0 }
 0x635   :  { %v2084_v33 = vadd.f32 %v633_v28, %v1973_v26  ;;  %v1588_v36 = vpop.f32.mrb[7].mxu0 }
 0x637   :  { %1589 = vmatprep.subr.msk.mxu1 %vm279_vm4, %v2084_v33 }
 0x638   :  { %1590 = vmatpush3.msk.msra.mxu1 %vm279_vm4, %v2084_v33 }
 0x639   :  { %1592 = vmatmul.mubr.msk.f32.vlgmr.msra.gmra.mrb[8].mxu1 %vm266_vm3, %v1978_v27  ;;  %1700 = vmatprep.subr.bf16.mxu1 %v1841_v0 }
 0x63a   :  { %1594 = vmatprep.mubr.msk.f32.mxu1 %vm266_vm3, %v1985_v29 }
 0x63d   :  { %1595 = vmatmul.mubr.msk.f32.gmra.mrb[10].mxu1 %vm266_vm3, %v1997_v30 }
 0x63e   :  { %1605 = vmatprep.mubr.msk.f32.mxu1 %vm1842_vm0, %v1843_v1 }
 0x70c   :  { %v1593_v26 = vpop.f32.mrb[8].mxu1 }
 0x70d   :  { %v727_v37 = vmul.f32 %v1593_v26, %v2003_v31  ;;  %v707_v38 = vpop.f32.mrb[9].mxu1 }
 0x70e   :  { %v726_v39 = vmul.f32 %v707_v38, %v2005_v32 }
 0x70f   :  { %v733_v40 = vsel %vm182_vm1, %v727_v37, 0.0 }
 0x710   :  { %734 = vadd.xlane.f32.xlu0 %v733_v40  ;;  %v1596_v41 = vpop.f32.mrb[10].mxu1  ;;  %v730_v42 = vsel %vm182_vm1, %v726_v39, 0.0 }
 0x711   :  { %v729_v43 = vmul.f32 %v1596_v41, %v2009_v34  ;;  %731 = vadd.xlane.f32.xlu1 %v730_v42  ;;  %v717_v44 = vpop.f32.mrb[11].mxu1 }
 0x712   :  { %v728_v45 = vmul.f32 %v717_v44, %v2011_v35 }
 0x713   :  { %v739_v46 = vsel %vm182_vm1, %v729_v43, 0.0 }
 0x714   :  { %v736_v47 = vsel %vm182_vm1, %v728_v45, 0.0 }
 0x715   :  { %740 = vadd.xlane.f32.xlu1 %v739_v46  ;;  %737 = vadd.xlane.f32.xlu0 %v736_v47 }
 0x79d   :  { %v735_v48 = vpop.xlane.xlu0 %734 }
 0x79e   :  { %v743_v49 = vmul.f32 %v735_v48, %v2031_v51  ;;  %v732_v52 = vpop.xlane.xlu1 %731 }
 0x79f   :  { %v742_v53 = vmul.f32 %v732_v52, %v2026_v50  ;;  %v1313_v52 = vld [vmem:[#allocation5 + $0x8] sm:$0xff] }
 0x7a1   :  { %v1701_v54 = vpack.c.bf16 %v743_v49, %v742_v53  ;;  %v1312_v49 = vld [vmem:[#allocation5] sm:$0xff] }
 0x7a2   :  { %v741_v55 = vpop.xlane.xlu1 %740  ;;  %v738_v58 = vpop.xlane.xlu0 %737  ;;  %v1725_v53 = vpack.c.bf16 %v1313_v52, %v1312_v49 }
 0x7a3   :  { %v745_v59 = vmul.f32 %v741_v55, %v2043_v57  ;;  %v744_v60 = vmul.f32 %v738_v58, %v2038_v56  ;;  %1702 = vmatpush3.bf16.msra.mxu1 %v1701_v54 }
 0x7a4   :  { %1703 = vmatprep.subr.bf16.mxu1 %v1841_v0 }
 0x7a5   :  { %v1704_v61 = vpack.c.bf16 %v745_v59, %v744_v60  ;;  %v1315_v59 = vld [vmem:[#allocation5 + $0x18] sm:$0xff] }
 0x7a7   :  { %1705 = vmatpush3.bf16.msra.mxu1 %v1704_v61 }
 0x7aa   :  { %1606 = vmatmul.mubr.msk.f32.vlgmr.msra.gmra.mrb[12].mxu1 %vm182_vm1, %v2051_v63 }
 0x7ab   :  { %1626 = vmatprep.mubr.msk.f32.mxu1 %vm266_vm3, %v1967_v22 }
 0x87d   :  { %v812_v62 = vpop.f32.mrb[12].mxu1 }
 0x87e   :  { %v1607_v2 = vpop.f32.mrb[13].mxu1  ;;  %v816_v3 = vsel %vm461_vm5, %v812_v62, -inf }
 0x87f   :  { %817 = vmax.xlane.f32.xlu0 %v816_v3 }
 0x90c   :  { %v818_v4 = vpop.xlane.xlu0 %817 }
 0x90d   :  { %v819_v5 = vsub.f32 %v812_v62, %v818_v4 }
 0x90f   :  { %v820_v6 = vmul.f32 1.442695, %v819_v5 }
 0x911   :  { %1755 = vpow2.f32 %v820_v6 }
 0x91b   :  { %v1756_v7 = vpop.eup %1755 }
 0x91c   :  { %v822_v8 = vsel %vm461_vm5, %v1756_v7, 0.0 }
 0x91d   :  { %823 = vadd.xlane.f32.xlu1 %v822_v8 }
 0x9aa   :  { %v824_v9 = vpop.xlane.xlu1 %823 }
 0x9ab   :  { %1757 = vrcp.f32 %v824_v9 }
 0x9b5   :  { %v1758_v10 = vpop.eup %1757 }
 0x9b6   :  { %v826_v12 = vmul.f32 %v1758_v10, %v1756_v7 }
 0x9b8   :  { %1611 = vmatmul.mubr.msk.f32.vlgmr.msra.gmra.mrb[8].mxu0 %vm473_vm6, %v826_v12 }
 0x9b9   :  { %1708 = vmatpush3.bf16.msra.mxu0 %v2059_v11  ;;  %1621 = vmatprep.mubr.msk.f32.mxu0 %vm1842_vm0, %v1843_v1 }
 0x9ba   :  { %1709 = vmatprep.subr.bf16.mxu0 %v1841_v0 }
 0x9bd   :  { %1711 = vmatpush3.bf16.msra.mxu0 %v2070_v19 }
 0x9be   :  { %1643 = vmatprep.subr.mxu0 %v1843_v1 }
 0xa8b   :  { %v896_v22 = vpop.f32.mrb[8].mxu0 }
 0xa8c   :  { %v900_v13 = vmul.f32 %v896_v22, %v2051_v63  ;;  %v1612_v15 = vpop.f32.mrb[9].mxu0 }
 0xa8e   :  { %1622 = vmatmul.mubr.msk.f32.vlgmr.msra.gmra.mrb[10].mxu0 %vm182_vm1, %v900_v13 }
 0xa8f   :  { %1644 = vmatpush3.msra.mxu0 %v2067_v14  ;;  %1645 = vmatprep.mubr.msk.f32.mxu0 %vm1842_vm0, %v1843_v1 }
 0xa90   :  { %1718 = vmatprep.subr.bf16.mxu0 %v1841_v0 }
 0xb61   :  { %v970_v16 = vpop.f32.mrb[10].mxu0 }
 0xb62   :  { %v2132_v17 = vadd.f32 %v970_v16, %v2084_v33  ;;  %v1623_v18 = vpop.f32.mrb[11].mxu0 }
 0xb64   :  { %1624 = vmatprep.subr.msk.mxu1 %vm279_vm4, %v2132_v17 }
 0xb65   :  { %1625 = vmatpush3.msk.msra.mxu1 %vm279_vm4, %v2132_v17 }
 0xb66   :  { %1627 = vmatmul.mubr.msk.f32.vlgmr.msra.gmra.mrb[14].mxu1 %vm266_vm3, %v1978_v27  ;;  %1712 = vmatprep.subr.bf16.mxu1 %v1841_v0 }
 0xb67   :  { %1629 = vmatprep.mubr.msk.f32.mxu1 %vm266_vm3, %v1985_v29 }
 0xb6a   :  { %1630 = vmatmul.mubr.msk.f32.gmra.mrb[16].mxu1 %vm266_vm3, %v1997_v30 }
 0xb6b   :  { %1640 = vmatprep.mubr.msk.f32.mxu1 %vm1842_vm0, %v1843_v1 }
 0xc39   :  { %v1628_v14 = vpop.f32.mrb[14].mxu1 }
 0xc3a   :  { %v1064_v20 = vmul.f32 %v1628_v14, %v2003_v31  ;;  %v1044_v21 = vpop.f32.mrb[15].mxu1 }
 0xc3b   :  { %v1063_v23 = vmul.f32 %v1044_v21, %v2005_v32 }
 0xc3c   :  { %v1070_v24 = vsel %vm182_vm1, %v1064_v20, 0.0 }
 0xc3d   :  { %1071 = vadd.xlane.f32.xlu1 %v1070_v24  ;;  %v1631_v27 = vpop.f32.mrb[16].mxu1  ;;  %v1067_v25 = vsel %vm182_vm1, %v1063_v23, 0.0 }
 0xc3e   :  { %v1066_v29 = vmul.f32 %v1631_v27, %v2009_v34  ;;  %1068 = vadd.xlane.f32.xlu0 %v1067_v25  ;;  %v1054_v28 = vpop.f32.mrb[17].mxu1 }
 0xc3f   :  { %v1065_v30 = vmul.f32 %v1054_v28, %v2011_v35 }
 0xc40   :  { %v1076_v33 = vsel %vm182_vm1, %v1066_v29, 0.0 }
 0xc41   :  { %1077 = vadd.xlane.f32.xlu1 %v1076_v33  ;;  %v1073_v31 = vsel %vm182_vm1, %v1065_v30, 0.0 }
 0xc42   :  { %1074 = vadd.xlane.f32.xlu0 %v1073_v31 }
 0xcca   :  { %v1072_v36 = vpop.xlane.xlu1 %1071 }
 0xccb   :  { %v1080_v32 = vmul.f32 %v1072_v36, %v2031_v51  ;;  %v1069_v26 = vpop.xlane.xlu0 %1068 }
 0xccc   :  { %v1079_v37 = vmul.f32 %v1069_v26, %v2026_v50 }
 0xcce   :  { %v1713_v38 = vpack.c.bf16 %v1080_v32, %v1079_v37  ;;  %v1078_v39 = vpop.xlane.xlu1 %1077 }
 0xccf   :  { %v1082_v34 = vmul.f32 %v1078_v39, %v2043_v57  ;;  %v1075_v40 = vpop.xlane.xlu0 %1074 }
 0xcd0   :  { %v1081_v41 = vmul.f32 %v1075_v40, %v2038_v56  ;;  %1714 = vmatpush3.bf16.msra.mxu1 %v1713_v38 }
 0xcd1   :  { %1715 = vmatprep.subr.bf16.mxu1 %v1841_v0 }
 0xcd2   :  { %v1716_v35 = vpack.c.bf16 %v1082_v34, %v1081_v41 }
 0xcd4   :  { %1717 = vmatpush3.bf16.msra.mxu1 %v1716_v35 }
 0xcd5   :  { %1724 = vmatprep.subr.bf16.mxu1 %v1841_v0 }
 0xcd7   :  { %1641 = vmatmul.mubr.msk.f32.vlgmr.msra.gmra.mrb[18].mxu1 %vm182_vm1, %v2051_v63 }
 0xcd8   :  { %1667 = vmatprep.mubr.msk.f32.mxu1 %vm1842_vm0, %v1843_v1  ;;  %1726 = vmatpush3.bf16.msra.mxu1 %v1725_v53 }
 0xcd9   :  { %1727 = vmatprep.subr.bf16.mxu1 %v1841_v0 }
 0xdaa   :  { %v1149_v50 = vpop.f32.mrb[18].mxu1 }
 0xdab   :  { %v1153_v51 = vsel %vm461_vm5, %v1149_v50, -inf  ;;  %v1642_v57 = vpop.f32.mrb[19].mxu1 }
 0xdac   :  { %1154 = vmax.xlane.f32.xlu0 %v1153_v51 }
 0xe39   :  { %v1155_v42 = vpop.xlane.xlu0 %1154 }
 0xe3a   :  { %v1156_v56 = vsub.f32 %v1149_v50, %v1155_v42 }
 0xe3c   :  { %v1157_v43 = vmul.f32 1.442695, %v1156_v56 }
 0xe3e   :  { %1759 = vpow2.f32 %v1157_v43 }
 0xe48   :  { %v1760_v44 = vpop.eup %1759 }
 0xe49   :  { %v1159_v45 = vsel %vm461_vm5, %v1760_v44, 0.0 }
 0xe4a   :  { %1160 = vadd.xlane.f32.xlu1 %v1159_v45 }
 0xed7   :  { %v1161_v46 = vpop.xlane.xlu1 %1160 }
 0xed8   :  { %1761 = vrcp.f32 %v1161_v46 }
 0xee2   :  { %v1762_v47 = vpop.eup %1761 }
 0xee3   :  { %v1163_v48 = vmul.f32 %v1762_v47, %v1760_v44 }
 0xee5   :  { %1646 = vmatmul.mubr.msk.f32.vlgmr.msra.gmra.mrb[12].mxu0 %vm473_vm6, %v1163_v48 }
 0xee6   :  { %1720 = vmatpush3.bf16.msra.mxu0 %v2059_v11  ;;  %1656 = vmatprep.mubr.msk.f32.mxu0 %vm1842_vm0, %v1843_v1  ;;  %v1314_v11 = vld [vmem:[#allocation5 + $0x10] sm:$0xff] }
 0xee7   :  { %1721 = vmatprep.subr.bf16.mxu0 %v1841_v0  ;;  %v1728_v60 = vpack.c.bf16 %v1315_v59, %v1314_v11  ;;  %v1443_v0 = vld [vmem:[%s2202_s9] ss:$0 sm:$0xff] }
 0xee9   :  { %1729 = vmatpush3.bf16.msra.mxu1 %v1728_v60 }
 0xeea   :  { %1723 = vmatpush3.bf16.msra.mxu0 %v2070_v19 }
 0xfb8   :  { %v1233_v54 = vpop.f32.mrb[12].mxu0 }
 0xfb9   :  { %v1237_v55 = vmul.f32 %v1233_v54, %v2051_v63  ;;  %v1647_v58 = vpop.f32.mrb[13].mxu0 }
 0xfbb   :  { %1657 = vmatmul.mubr.msk.f32.vlgmr.msra.gmra.mrb[14].mxu0 %vm182_vm1, %v1237_v55 }
0x108e   :  { %v1307_v1 = vpop.f32.mrb[14].mxu0 }
0x108f   :  { %v1311_v61 = vadd.f32 %v1307_v1, %v2132_v17  ;;  %v1658_v19 = vpop.f32.mrb[15].mxu0 }
0x1091   :  { %1668 = vmatmul.mubr.msk.f32.vlgmr.msra.gmra.mrb[20].mxu1 %vm182_vm1, %v1311_v61 }
0x1164   :  { %v1392_v63 = vpop.f32.mrb[20].mxu1 }
0x1165   :  { %v1393_v62 = vadd.f32 %v1443_v0, %v1392_v63  ;;  %v1669_v2 = vpop.f32.mrb[21].mxu1 }
0x1167   :  { %1397 = vst.msk [vmem:[#allocation7] sm:$0xf] %vm1396_vm7, %v1393_v62 }
0x1168   :  { %1818 = shalt.err (!%p1815_p6)
}
0x1169   :  { %s1819_s18 = scalar_lea.hbm %s2203_s10, 64 }
0x116a   :  { %p1820_p7 = scmp.ne.s32.totalorder %s2203_s10, %s1819_s18  ;;  %p1823_p8 = scmp.lt.u32.totalorder %s1819_s18, %s2203_s10 }
0x116c   :  { %p1825_p9 = pnand %p1823_p8, %p1820_p7 }
0x116e   :  { %1828 = shalt.err (!%p1825_p9)
}
0x116f   :  { %1407 = dma.vmem_to_hbm [thread:$0]  %s1405_s7, 64, %s2203_s10, [#allocation4]  }
0x1170   :  { %1833 = dma.done.wait [#allocation4], 64  }
0x1171   :  { %1834 = vsyncadd [#allocation4], 4294967232 }
0x1172   :  { %1411 = vsyncpa [#allocation3], 1 }
0x1173   :  { %1412 = vsyncpa [#allocation6], 1 }
0x1174   :  { %1413 = vsyncpa [#allocation4], 1 }

</bundles_post_ra>
